<compile_context>
chip_gen: v7x
topology: tpu7x:2x2x1
jax: 0.10.0
libtpu: 0.0.40
codegen_flags: <defaults>
</compile_context>

<pallas_src>
import functools
import math

import jax
import jax.numpy as jnp
from jax.experimental import pallas as pl
from jax.experimental.pallas import tpu as pltpu


def _round_up(x, m):
    return ((x + m - 1) // m) * m


def _quant_softmax_kernel(*refs, has_mask: bool, use_act_quant: bool, qmax: float):
    if has_mask:
        x_ref, m_ref, o_ref = refs
    else:
        x_ref, o_ref = refs

    x = x_ref[...].astype(jnp.float32)
    if has_mask:
        x = x + m_ref[...].astype(jnp.float32)

    # Numerically stable softmax over the last (lane) axis, computed in f32.
    row_max = jnp.max(x, axis=-1, keepdims=True)
    p = jnp.exp(x - row_max)
    denom = jnp.sum(p, axis=-1, keepdims=True)
    out = p * pl.reciprocal(denom, approx=False)  # per-row reciprocal, per-elem multiply

    if use_act_quant:
        # TODO(synk): Quantizer internals not provided in the spec; assuming per-token
        # symmetric dynamic 8-bit fake quantization (scale = amax/127, clamp to +-127).
        amax = jnp.maximum(jnp.max(jnp.abs(out), axis=-1, keepdims=True), 1e-8)
        scale = amax / qmax
        inv_scale = qmax / amax                      # hoisted per-row divide
        q = jnp.clip(jnp.round(out * inv_scale), -qmax, qmax)
        out = q * scale

    o_ref[...] = out.astype(o_ref.dtype)


def quant_softmax(attn_weights, attn_mask=None, *, dim=-1, use_act_quant=False,
                  bits=8, row_block=256):
    """Pallas implementation of QuantSoftmax.forward."""
    i_dtype = attn_weights.dtype
    ndim = attn_weights.ndim
    axis = dim % ndim

    x = attn_weights
    mask = attn_mask
    if mask is not None:
        mask = jnp.broadcast_to(mask, x.shape)
    if axis != ndim - 1:
        x = jnp.moveaxis(x, axis, -1)
        if mask is not None:
            mask = jnp.moveaxis(mask, axis, -1)

    work_shape = x.shape
    hidden = work_shape[-1]
    rows = int(math.prod(work_shape[:-1])) if ndim > 1 else 1

    x2 = x.reshape(rows, hidden)
    m2 = mask.reshape(rows, hidden) if mask is not None else None

    # Lane-dense last dim (multiple of 128).
    hidden_p = _round_up(hidden, 128)

    # Generation-safe row tile: big enough to amortize ~0.35us/grid-step, small enough
    # that double-buffered IO + f32 intermediates stay under ~24 MiB of VMEM.
    n_io = 3 if m2 is not None else 2
    itemsize = jnp.dtype(i_dtype).itemsize
    vmem_budget = 24 << 20
    per_row_bytes = hidden_p * (n_io * 2 * itemsize + 3 * 4)  # 2x-buffered IO + f32 temps
    max_rb = max(8, (vmem_budget // per_row_bytes) // 8 * 8)
    rb = max(8, min(_round_up(row_block, 8), max_rb, _round_up(rows, 8)))

    rows_p = _round_up(rows, rb)

    if jnp.issubdtype(i_dtype, jnp.floating):
        neg_fill = -0.7 * float(jnp.finfo(i_dtype).max)
    else:
        neg_fill = -1e30

    pad_r, pad_c = rows_p - rows, hidden_p - hidden
    if pad_r or pad_c:
        x2 = jnp.pad(x2, ((0, pad_r), (0, pad_c)), constant_values=neg_fill)
        if m2 is not None:
            m2 = jnp.pad(m2, ((0, pad_r), (0, pad_c)), constant_values=0.0)

    qmax = float(2 ** (bits - 1) - 1)  # 127 for 8 bits (symmetric signed)
    has_mask = m2 is not None

    kernel = functools.partial(
        _quant_softmax_kernel, has_mask=has_mask,
        use_act_quant=use_act_quant, qmax=qmax,
    )

    block = (rb, hidden_p)
    in_specs = [pl.BlockSpec(block, lambda i: (i, 0))]
    inputs = [x2]
    if has_mask:
        in_specs.append(pl.BlockSpec(block, lambda i: (i, 0)))
        inputs.append(m2)

    cost = pl.CostEstimate(
        flops=6 * rows_p * hidden_p,
        transcendentals=rows_p * hidden_p,
        bytes_accessed=(len(inputs) + 1) * rows_p * hidden_p * itemsize,
    )

    out2 = pl.pallas_call(
        kernel,
        out_shape=jax.ShapeDtypeStruct((rows_p, hidden_p), i_dtype),
        grid_spec=pltpu.PrefetchScalarGridSpec(
            num_scalar_prefetch=0,
            grid=(rows_p // rb,),
            in_specs=in_specs,
            out_specs=pl.BlockSpec(block, lambda i: (i, 0)),
        ),
        compiler_params=pltpu.CompilerParams(
            dimension_semantics=("parallel",),
            vmem_limit_bytes=40 * 1024 * 1024,
        ),
        cost_estimate=cost,
    )(*inputs)

    out = out2[:rows, :hidden].reshape(work_shape)
    if axis != ndim - 1:
        out = jnp.moveaxis(out, -1, axis)
    return out


def _reference(attn, mask, use_act_quant, bits=8):
    x = attn.astype(jnp.float32)
    if mask is not None:
        x = x + jnp.broadcast_to(mask, attn.shape).astype(jnp.float32)
    out = jax.nn.softmax(x, axis=-1)
    if use_act_quant:
        qmax = float(2 ** (bits - 1) - 1)
        amax = jnp.maximum(jnp.max(jnp.abs(out), axis=-1, keepdims=True), 1e-8)
        scale = amax / qmax
        out = jnp.clip(jnp.round(out * (qmax / amax)), -qmax, qmax) * scale
    return out.astype(attn.dtype)


if __name__ == "__main__":
    key = jax.random.PRNGKey(0)
    k1, _ = jax.random.split(key)

    batch, heads, q_len, kv_len = 2, 4, 8, 32
    attn = jax.random.normal(k1, (batch, heads, q_len, kv_len), dtype=jnp.float32)

    # Additive causal-style mask, broadcast over heads.
    keep = jnp.tril(jnp.ones((q_len, kv_len), dtype=bool), k=kv_len - q_len)
    mask = jnp.where(keep, 0.0, -1e9).astype(jnp.float32)
    mask = jnp.broadcast_to(mask, (batch, 1, q_len, kv_len))

    # 1) Plain softmax (no mask, no quant).
    out1 = quant_softmax(attn, None, use_act_quant=False)
    jax.block_until_ready(out1)
    assert jnp.allclose(out1, _reference(attn, None, False), atol=2e-6), \
        "softmax (no mask) mismatch"

    # 2) Masked softmax.
    out2 = quant_softmax(attn, mask, use_act_quant=False)
    jax.block_until_ready(out2)
    assert jnp.allclose(out2, _reference(attn, mask, False), atol=2e-6), \
        "softmax (mask) mismatch"

    # 3) Masked softmax + per-token 8-bit dynamic fake quant.
    out3 = quant_softmax(attn, mask, use_act_quant=True)
    jax.block_until_ready(out3)
    assert jnp.allclose(out3, _reference(attn, mask, True), atol=1e-5), \
        "quantized softmax mismatch"

    print("KERNEL_OK")
</pallas_src>

<mosaic_0001>
module attributes {stable_mosaic.version = 11 : i64} {
  func.func @_quant_softmax_kernel(%arg0: i32, %arg1: memref<64x128xf32, #tpu.memory_space<vmem>>, %arg2: memref<64x128xf32, #tpu.memory_space<vmem>>) attributes {dimension_semantics = [#tpu.dimension_semantics<parallel>], iteration_bounds = array<i64: 1>, scalar_prefetch = 0 : i64, scratch_operands = 0 : i64, tpu.core_type = #tpu.core_type<tc>, window_params = [{transform_indices = @transform_0, window_bounds = array<i64: 64, 128>}, {transform_indices = @transform_1, window_bounds = array<i64: 64, 128>}]} {
    %c0 = arith.constant 0 : index
    %c0_0 = arith.constant 0 : index
    %0 = vector.load %arg1[%c0, %c0_0] : memref<64x128xf32, #tpu.memory_space<vmem>>, vector<64x128xf32>
    %cst = arith.constant dense<0xFF800000> : vector<64xf32>
    %1 = vector.multi_reduction <maximumf>, %0, %cst [1] : vector<64x128xf32> to vector<64xf32>
    %2 = vector.shape_cast %1 : vector<64xf32> to vector<64x1xf32>
    %3 = vector.broadcast %2 : vector<64x1xf32> to vector<64x128xf32>
    %4 = arith.subf %0, %3 : vector<64x128xf32>
    %5 = math.exp %4 : vector<64x128xf32>
    %cst_1 = arith.constant dense<0.000000e+00> : vector<64xf32>
    %6 = vector.multi_reduction <add>, %5, %cst_1 [1] : vector<64x128xf32> to vector<64xf32>
    %7 = vector.shape_cast %6 : vector<64xf32> to vector<64x1xf32>
    %8 = tpu.reciprocal %7 : vector<64x1xf32> -> vector<64x1xf32>
    %9 = vector.broadcast %8 : vector<64x1xf32> to vector<64x128xf32>
    %10 = arith.mulf %5, %9 : vector<64x128xf32>
    %c0_2 = arith.constant 0 : index
    %c0_3 = arith.constant 0 : index
    %11 = vector.load %arg2[%c0_2, %c0_3] : memref<64x128xf32, #tpu.memory_space<vmem>>, vector<64x128xf32>
    tpu.vector_store %arg2[%c0_2, %c0_3], %10 {strides = array<i32>} : memref<64x128xf32, #tpu.memory_space<vmem>>, vector<64x128xf32>,
    return
  }
  func.func @transform_0(%arg0: i32) -> (i32, i32) {
    %c0_i32 = arith.constant 0 : i32
    %c0_i32_0 = arith.constant 0 : i32
    return %arg0, %c0_i32 : i32, i32
  }
  func.func @transform_1(%arg0: i32) -> (i32, i32) {
    %c0_i32 = arith.constant 0 : i32
    %c0_i32_0 = arith.constant 0 : i32
    return %arg0, %c0_i32 : i32, i32
  }
}

</mosaic_0001>

<bundles_post_ra>
// kernel: tpu_custom_call.1
= control target key start
LH: loop header
LB: loop body
LE: loop exit
PB: predicated region body
PF: predicated region fallthrough
CT: control target
= control target key end

     0   :  { %6 = vsyncpa [#allocation3], 0  ;;  %s256_s0 = inlined_call_operand.hbm [shape: f32[64,128], index: 0, kind: input, shape index: {}]   ;;  %s257_s1 = inlined_call_operand.hbm [shape: f32[64,128], index: 1, kind: output, shape index: {}]  }
   0x1   :  { %7 = vsyncpa [#allocation4], 0  ;;  %s212_s6 = smov [#allocation2]   ;;  %s164_s10 = scalar_lea.hbm %s256_s0, 1024 }
   0x2   :  { %s13_s7 = sshll.u32 %s212_s6, 4  ;;  %p165_p0 = scmp.ne.s32.totalorder %s256_s0, %s164_s10  ;;  %s14_s7 = int_to_ptr.vmem [resolvable:$true] %s13_s7 }
   0x3   :  { %p168_p1 = scmp.lt.u32.totalorder %s164_s10, %s256_s0 }
   0x5   :  { %p170_p2 = pnand %p168_p1, %p165_p0 }
   0x7   :  { %173 = shalt.err (!%p170_p2)
}
   0x8   :  { %s174_s15 = scalar_lea.vmem %s14_s7, 1024  ;;  %p179_p4 = scmp.lt.s32.totalorder %s14_s7, %s14_s7 }
   0x9   :  { %p175_p3 = scmp.ne.s32.totalorder %s14_s7, %s174_s15  ;;  %p180_p5 = scmp.lt.s32.totalorder %s174_s15, %s174_s15 }
   0xb   :  { %p181_p6 = por %p180_p5, %p179_p4 }
   0xd   :  { %p182_p7 = pnand %p181_p6, %p175_p3 }
   0xf   :  { %185 = shalt.err (!%p182_p7)
}
  0x10   :  { %s213_s16 = smov 128   ;;  %s214_s17 = smov 8  }
  0x11   :  { %19 = dma.hbm_to_vmem [thread:$0]  %s256_s0, 1024, %s14_s7, [#allocation3], %s213_s16, %s213_s16, %s214_s17  }
  0x12   :  { %208 = dma.done.wait [#allocation3], 1024  }
  0x13   :  { %209 = vsyncadd [#allocation3], 4294966272  ;;  %v23_v0 = vld [vmem:[#allocation2] sm:$0xff]  ;;  %v25_v1 = vld [vmem:[#allocation2 + $0x10] sm:$0xff]  ;;  %s215_s0 = smov [#allocation5]  }
  0x14   :  { %31 = vmax.xlane.f32.xlu0 %v23_v0  ;;  %35 = vmax.xlane.f32.xlu1 %v25_v1  ;;  %v24_v2 = vld [vmem:[#allocation2 + $0x8] sm:$0xff]  ;;  %v26_v3 = vld [vmem:[#allocation2 + $0x18] sm:$0xff]  ;;  %v27_v4 = vld [vmem:[#allocation2 + $0x20] sm:$0xff]  ;;  %s116_s20 = sshll.u32 %s215_s0, 4  ;;  %s117_s20 = int_to_ptr.vmem [resolvable:$true] %s116_s20 }
  0x15   :  { %v28_v5 = vld [vmem:[#allocation2 + $0x28] sm:$0xff]  ;;  %v29_v6 = vld [vmem:[#allocation2 + $0x30] sm:$0xff]  ;;  %v30_v7 = vld [vmem:[#allocation2 + $0x38] sm:$0xff]  ;;  %s186_s21 = scalar_lea.vmem %s117_s20, 1024  ;;  %p191_p9 = scmp.lt.s32.totalorder %s117_s20, %s117_s20 }
  0x16   :  { %p187_p8 = scmp.ne.s32.totalorder %s117_s20, %s186_s21  ;;  %p192_p10 = scmp.lt.s32.totalorder %s186_s21, %s186_s21 }
  0x18   :  { %33 = vmax.xlane.f32.xlu0 %v24_v2  ;;  %37 = vmax.xlane.f32.xlu1 %v26_v3  ;;  %p193_p11 = por %p192_p10, %p191_p9 }
  0x1a   :  { %p194_p12 = pnand %p193_p11, %p187_p8 }
  0x1c   :  { %39 = vmax.xlane.f32.xlu0 %v27_v4  ;;  %41 = vmax.xlane.f32.xlu1 %v28_v5 }
  0x20   :  { %43 = vmax.xlane.f32.xlu0 %v29_v6  ;;  %45 = vmax.xlane.f32.xlu1 %v30_v7 }
  0xa1   :  { %v32_v8 = vpop.xlane.xlu0 %31  ;;  %v36_v9 = vpop.xlane.xlu1 %35 }
  0xa2   :  { %v47_v10 = vsub.f32 %v23_v0, %v32_v8  ;;  %v49_v11 = vsub.f32 %v25_v1, %v36_v9 }
  0xa4   :  { %v55_v12 = vmul.f32 1.442695, %v47_v10  ;;  %v59_v13 = vmul.f32 1.442695, %v49_v11 }
  0xa5   :  { %v34_v14 = vpop.xlane.xlu0 %33  ;;  %v38_v15 = vpop.xlane.xlu1 %37 }
  0xa6   :  { %132 = vpow2.f32 %v55_v12  ;;  %v48_v16 = vsub.f32 %v24_v2, %v34_v14  ;;  %v50_v17 = vsub.f32 %v26_v3, %v38_v15 }
  0xa7   :  { %134 = vpow2.f32 %v59_v13 }
  0xa8   :  { %v57_v18 = vmul.f32 1.442695, %v48_v16  ;;  %v61_v19 = vmul.f32 1.442695, %v50_v17 }
  0xa9   :  { %v40_v20 = vpop.xlane.xlu0 %39  ;;  %v42_v21 = vpop.xlane.xlu1 %41 }
  0xaa   :  { %136 = vpow2.f32 %v57_v18  ;;  %v51_v22 = vsub.f32 %v27_v4, %v40_v20  ;;  %v52_v23 = vsub.f32 %v28_v5, %v42_v21 }
  0xab   :  { %138 = vpow2.f32 %v61_v19 }
  0xac   :  { %v63_v24 = vmul.f32 1.442695, %v51_v22  ;;  %v65_v25 = vmul.f32 1.442695, %v52_v23 }
  0xad   :  { %v44_v26 = vpop.xlane.xlu0 %43  ;;  %v46_v27 = vpop.xlane.xlu1 %45 }
  0xae   :  { %140 = vpow2.f32 %v63_v24  ;;  %v53_v28 = vsub.f32 %v29_v6, %v44_v26  ;;  %v54_v29 = vsub.f32 %v30_v7, %v46_v27 }
  0xaf   :  { %142 = vpow2.f32 %v65_v25 }
  0xb0   :  { %v133_v30 = vpop.eup %132  ;;  %v67_v31 = vmul.f32 1.442695, %v53_v28  ;;  %v69_v32 = vmul.f32 1.442695, %v54_v29 }
  0xb1   :  { %71 = vadd.xlane.f32.xlu0 %v133_v30  ;;  %v135_v33 = vpop.eup %134 }
  0xb2   :  { %144 = vpow2.f32 %v67_v31 }
  0xb3   :  { %146 = vpow2.f32 %v69_v32 }
  0xb4   :  { %v137_v34 = vpop.eup %136 }
  0xb5   :  { %75 = vadd.xlane.f32.xlu0 %v135_v33  ;;  %73 = vadd.xlane.f32.xlu1 %v137_v34  ;;  %v139_v35 = vpop.eup %138 }
  0xb8   :  { %v141_v36 = vpop.eup %140 }
  0xb9   :  { %77 = vadd.xlane.f32.xlu1 %v139_v35  ;;  %79 = vadd.xlane.f32.xlu0 %v141_v36  ;;  %v143_v37 = vpop.eup %142 }
  0xbc   :  { %v145_v38 = vpop.eup %144 }
  0xbd   :  { %81 = vadd.xlane.f32.xlu1 %v143_v37  ;;  %83 = vadd.xlane.f32.xlu0 %v145_v38  ;;  %v147_v39 = vpop.eup %146 }
  0xc1   :  { %85 = vadd.xlane.f32.xlu1 %v147_v39 }
 0x13e   :  { %v72_v40 = vpop.xlane.xlu0 %71 }
 0x13f   :  { %148 = vrcp.f32 %v72_v40 }
 0x142   :  { %v74_v41 = vpop.xlane.xlu1 %73  ;;  %v76_v42 = vpop.xlane.xlu0 %75 }
 0x143   :  { %150 = vrcp.f32 %v74_v41 }
 0x144   :  { %152 = vrcp.f32 %v76_v42 }
 0x146   :  { %v78_v43 = vpop.xlane.xlu1 %77  ;;  %v80_v44 = vpop.xlane.xlu0 %79 }
 0x147   :  { %154 = vrcp.f32 %v78_v43 }
 0x148   :  { %156 = vrcp.f32 %v80_v44 }
 0x149   :  { %v149_v45 = vpop.eup %148 }
 0x14a   :  { %v95_v46 = vmul.f32 %v149_v45, %v133_v30  ;;  %v82_v47 = vpop.xlane.xlu1 %81  ;;  %v84_v48 = vpop.xlane.xlu0 %83 }
 0x14b   :  { %158 = vrcp.f32 %v82_v47 }
 0x14c   :  { %103 = vst [vmem:[#allocation5] sm:$0xff] %v95_v46  ;;  %160 = vrcp.f32 %v84_v48 }
 0x14d   :  { %v151_v49 = vpop.eup %150 }
 0x14e   :  { %v153_v50 = vpop.eup %152  ;;  %v96_v51 = vmul.f32 %v151_v49, %v137_v34  ;;  %v86_v52 = vpop.xlane.xlu1 %85 }
 0x14f   :  { %v97_v53 = vmul.f32 %v153_v50, %v135_v33  ;;  %162 = vrcp.f32 %v86_v52 }
 0x150   :  { %104 = vst [vmem:[#allocation5 + $0x8] sm:$0xff] %v96_v51 }
 0x151   :  { %v155_v54 = vpop.eup %154  ;;  %105 = vst [vmem:[#allocation5 + $0x10] sm:$0xff] %v97_v53 }
 0x152   :  { %v157_v55 = vpop.eup %156  ;;  %v98_v56 = vmul.f32 %v155_v54, %v139_v35 }
 0x153   :  { %v99_v57 = vmul.f32 %v157_v55, %v141_v36 }
 0x154   :  { %106 = vst [vmem:[#allocation5 + $0x18] sm:$0xff] %v98_v56 }
 0x155   :  { %v159_v58 = vpop.eup %158  ;;  %107 = vst [vmem:[#allocation5 + $0x20] sm:$0xff] %v99_v57 }
 0x156   :  { %v161_v59 = vpop.eup %160  ;;  %v100_v60 = vmul.f32 %v159_v58, %v143_v37 }
 0x157   :  { %v101_v61 = vmul.f32 %v161_v59, %v145_v38 }
 0x158   :  { %108 = vst [vmem:[#allocation5 + $0x28] sm:$0xff] %v100_v60 }
 0x159   :  { %v163_v62 = vpop.eup %162  ;;  %109 = vst [vmem:[#allocation5 + $0x30] sm:$0xff] %v101_v61 }
 0x15a   :  { %v102_v63 = vmul.f32 %v163_v62, %v147_v39 }
 0x15c   :  { %110 = vst [vmem:[#allocation5 + $0x38] sm:$0xff] %v102_v63 }
 0x15d   :  { %197 = shalt.err (!%p194_p12)
}
 0x15e   :  { %s198_s24 = scalar_lea.hbm %s257_s1, 1024 }
 0x15f   :  { %p199_p13 = scmp.ne.s32.totalorder %s257_s1, %s198_s24  ;;  %p202_p0 = scmp.lt.u32.totalorder %s198_s24, %s257_s1 }
 0x161   :  { %p204_p1 = pnand %p202_p0, %p199_p13 }
 0x163   :  { %207 = shalt.err (!%p204_p1)
}
 0x164   :  { %122 = dma.vmem_to_hbm [thread:$0]  %s117_s20, 1024, %s257_s1, [#allocation4], %s213_s16, %s213_s16, %s214_s17  }
 0x165   :  { %210 = dma.done.wait [#allocation4], 1024  }
 0x166   :  { %211 = vsyncadd [#allocation4], 4294966272 }
 0x167   :  { %126 = vsyncpa [#allocation3], 1 }
 0x168   :  { %127 = vsyncpa [#allocation4], 1 }

</bundles_post_ra>
